<compile_context>
chip_gen: v7x
topology: tpu7x:2x2x1
jax: 0.10.0
libtpu: 0.0.40
codegen_flags: <defaults>
</compile_context>

<pallas_src>
import functools
import math

import jax
import jax.numpy as jnp
from jax.experimental import pallas as pl
from jax.experimental.pallas import tpu as pltpu


def _pick_tile(total, candidates):
    """Largest candidate that evenly divides `total`, else the full extent."""
    for c in candidates:
        if total % c == 0:
            return c
    return total


# ----------------------- fused attention sub-block kernel -----------------------

def _attn_block_kernel(x_ref, g1_ref, b1_ref, wqkv_ref, bqkv_ref,
                       wproj_ref, bproj_ref, o_ref, *, n_head, eps):
    """out = x + c_proj(causal_attn(LN1(x)))  for one batch element."""
    x = x_ref[0].astype(jnp.float32)                       # (T, D)
    T, D = x.shape
    Dh = D // n_head
    scale = 1.0 / math.sqrt(Dh)

    # --- LayerNorm 1 (f32 statistics) ---
    mean = jnp.mean(x, axis=-1, keepdims=True)
    xc = x - mean
    var = jnp.mean(xc * xc, axis=-1, keepdims=True)
    xn = xc * jax.lax.rsqrt(var + eps) * g1_ref[...] + b1_ref[...]

    # --- fused QKV projection ---
    qkv = jnp.dot(xn, wqkv_ref[...],
                  preferred_element_type=jnp.float32) + bqkv_ref[...]   # (T, 3D)

    # --- additive causal bias, built once and shared across heads ---
    row = jax.lax.broadcasted_iota(jnp.int32, (T, T), 0)
    col = jax.lax.broadcasted_iota(jnp.int32, (T, T), 1)
    causal_bias = jnp.where(row >= col, 0.0, -1e30).astype(jnp.float32)

    wproj = wproj_ref[...].astype(jnp.float32)             # (D, D)

    # --- per-head attention; fold the head-concat + projection into a row-slab sum ---
    y = jnp.zeros_like(x)                                  # (T, D) projected output
    for h in range(n_head):
        q = qkv[:, h * Dh:(h + 1) * Dh] * scale            # scale q (T*Dh), not scores (T*T)
        k = qkv[:, D + h * Dh: D + (h + 1) * Dh]
        v = qkv[:, 2 * D + h * Dh: 2 * D + (h + 1) * Dh]
        # q @ k^T without materializing an explicit transpose of k.
        s = jax.lax.dot_general(q, k, (((1,), (1,)), ((), ())),
                                preferred_element_type=jnp.float32)    # (T, T)
        s = s + causal_bias
        m = jnp.max(s, axis=-1, keepdims=True)
        p = jnp.exp(s - m)
        denom = jnp.sum(p, axis=-1, keepdims=True)
        o = jnp.dot(p, v, preferred_element_type=jnp.float32)
        o = o * pl.reciprocal(denom, approx=True)          # EUP slot, essentially free
        # concat(o_0..o_{H-1}) @ wproj == sum_h o_h @ wproj[h*Dh:(h+1)*Dh, :]
        y = y + jnp.dot(o, wproj[h * Dh:(h + 1) * Dh, :],
                        preferred_element_type=jnp.float32)

    o_ref[0] = (x + y + bproj_ref[...]).astype(o_ref.dtype)


def attn_block(x, blk, *, n_head, eps=1e-5):
    B, T, D = x.shape
    kern = functools.partial(_attn_block_kernel, n_head=n_head, eps=eps)
    act_spec = pl.BlockSpec((1, T, D), lambda b: (b, 0, 0))

    def full(shape):
        return pl.BlockSpec(shape, lambda b: (0, 0))

    return pl.pallas_call(
        kern,
        out_shape=jax.ShapeDtypeStruct((B, T, D), x.dtype),
        grid=(B,),
        in_specs=[
            act_spec,
            full((1, D)), full((1, D)),
            full((D, 3 * D)), full((1, 3 * D)),
            full((D, D)), full((1, D)),
        ],
        out_specs=act_spec,
        compiler_params=pltpu.CompilerParams(dimension_semantics=("parallel",)),
    )(x,
      blk["ln1_g"].reshape(1, D), blk["ln1_b"].reshape(1, D),
      blk["attn_w"], blk["attn_b"].reshape(1, 3 * D),
      blk["proj_w"], blk["proj_b"].reshape(1, D))


# -------------------------- fused MLP sub-block kernel --------------------------

def _mlp_block_kernel(x_ref, g2_ref, b2_ref, wfc_ref, bfc_ref,
                      wproj_ref, bproj_ref, o_ref, *, eps):
    """out = x + c_proj(gelu_tanh(c_fc(LN2(x)))) for a row tile."""
    x = x_ref[...].astype(jnp.float32)                     # (tm, D)
    mean = jnp.mean(x, axis=-1, keepdims=True)
    xc = x - mean
    var = jnp.mean(xc * xc, axis=-1, keepdims=True)
    xn = xc * jax.lax.rsqrt(var + eps) * g2_ref[...] + b2_ref[...]

    h = jnp.dot(xn, wfc_ref[...],
                preferred_element_type=jnp.float32) + bfc_ref[...]     # (tm, F)
    c = math.sqrt(2.0 / math.pi)
    h = 0.5 * h * (1.0 + jnp.tanh(c * (h + 0.044715 * h * h * h)))     # tanh-GELU

    y = jnp.dot(h, wproj_ref[...],
                preferred_element_type=jnp.float32) + bproj_ref[...]   # (tm, D)
    o_ref[...] = (x + y).astype(o_ref.dtype)


def mlp_block(x, blk, *, eps=1e-5):
    B, T, D = x.shape
    M = B * T
    F = blk["fc_w"].shape[1]
    x2 = x.reshape(M, D)
    tm = _pick_tile(M, (256, 128, 64, 32, 16, 8))
    kern = functools.partial(_mlp_block_kernel, eps=eps)

    out = pl.pallas_call(
        kern,
        out_shape=jax.ShapeDtypeStruct((M, D), x.dtype),
        grid=(M // tm,),
        in_specs=[
            pl.BlockSpec((tm, D), lambda i: (i, 0)),
            pl.BlockSpec((1, D), lambda i: (0, 0)),
            pl.BlockSpec((1, D), lambda i: (0, 0)),
            pl.BlockSpec((D, F), lambda i: (0, 0)),
            pl.BlockSpec((1, F), lambda i: (0, 0)),
            pl.BlockSpec((F, D), lambda i: (0, 0)),
            pl.BlockSpec((1, D), lambda i: (0, 0)),
        ],
        out_specs=pl.BlockSpec((tm, D), lambda i: (i, 0)),
        compiler_params=pltpu.CompilerParams(dimension_semantics=("parallel",)),
    )(x2,
      blk["ln2_g"].reshape(1, D), blk["ln2_b"].reshape(1, D),
      blk["fc_w"], blk["fc_b"].reshape(1, F),
      blk["fcproj_w"], blk["fcproj_b"].reshape(1, D))
    return out.reshape(B, T, D)


# ---------------------- fused final LayerNorm + lm_head -------------------------

def _lnf_head_kernel(x_ref, g_ref, b_ref, w_ref, o_ref, *, eps):
    """out = LN_f(x) @ W_head  (no bias)."""
    x = x_ref[...].astype(jnp.float32)                     # (tm, D)
    mean = jnp.mean(x, axis=-1, keepdims=True)
    xc = x - mean
    var = jnp.mean(xc * xc, axis=-1, keepdims=True)
    xn = xc * jax.lax.rsqrt(var + eps) * g_ref[...] + b_ref[...]
    o_ref[...] = jnp.dot(xn, w_ref[...],
                         preferred_element_type=jnp.float32).astype(o_ref.dtype)


def lnf_head(x, gamma, beta, w, *, eps=1e-5):
    B, T, D = x.shape
    M = B * T
    V = w.shape[1]
    x2 = x.reshape(M, D)
    tm = _pick_tile(M, (256, 128, 64, 32, 16, 8))
    tn = _pick_tile(V, (2048, 1024, 512, 256, 128))
    kern = functools.partial(_lnf_head_kernel, eps=eps)

    out = pl.pallas_call(
        kern,
        out_shape=jax.ShapeDtypeStruct((M, V), x.dtype),
        grid=(M // tm, V // tn),
        in_specs=[
            pl.BlockSpec((tm, D), lambda i, j: (i, 0)),
            pl.BlockSpec((1, D), lambda i, j: (0, 0)),
            pl.BlockSpec((1, D), lambda i, j: (0, 0)),
            pl.BlockSpec((D, tn), lambda i, j: (0, j)),
        ],
        out_specs=pl.BlockSpec((tm, tn), lambda i, j: (i, j)),
        compiler_params=pltpu.CompilerParams(
            dimension_semantics=("parallel", "parallel")),
    )(x2, gamma.reshape(1, D), beta.reshape(1, D), w)
    return out.reshape(B, T, V)


# ------------------------------ Model (glue) --------------------------------

def init_params(key, cfg):
    V, D, F, L, P = (cfg["vocab_size"], cfg["d_model"], cfg["ff_hidden"],
                     cfg["n_blocks"], cfg["block_size"])
    keys = jax.random.split(key, 4 + 4 * L)
    std = 0.02

    def w(k, shape):
        return jax.random.normal(k, shape, dtype=jnp.float32) * std

    params = {
        "wte": w(keys[0], (V, D)),
        "wpe": w(keys[1], (P, D)),
        "lnf_g": jnp.ones((D,), jnp.float32),
        "lnf_b": jnp.zeros((D,), jnp.float32),
        "lm_head_w": w(keys[2], (D, V)),   # no bias in lm_head
        "blocks": [],
    }
    for l in range(L):
        kb = jax.random.split(keys[4 + l], 4)
        params["blocks"].append({
            "ln1_g": jnp.ones((D,), jnp.float32),
            "ln1_b": jnp.zeros((D,), jnp.float32),
            "attn_w": w(kb[0], (D, 3 * D)),
            "attn_b": jnp.zeros((3 * D,), jnp.float32),
            "proj_w": w(kb[1], (D, D)),
            "proj_b": jnp.zeros((D,), jnp.float32),
            "ln2_g": jnp.ones((D,), jnp.float32),
            "ln2_b": jnp.zeros((D,), jnp.float32),
            "fc_w": w(kb[2], (D, F)),
            "fc_b": jnp.zeros((F,), jnp.float32),
            "fcproj_w": w(kb[3], (F, D)),
            "fcproj_b": jnp.zeros((D,), jnp.float32),
        })
    return params


def sarika_forward(params, tokens, cfg):
    B, T = tokens.shape
    H = cfg["n_head"]

    # Embedding lookups stay as plain-JAX glue (gather).
    x = params["wte"][tokens] + params["wpe"][:T][None, :, :]   # (B, T, D)

    for blk in params["blocks"]:
        x = attn_block(x, blk, n_head=H)    # fused LN1 + QKV + attention + proj + residual
        x = mlp_block(x, blk)               # fused LN2 + fc + gelu + fcproj + residual

    return lnf_head(x, params["lnf_g"], params["lnf_b"], params["lm_head_w"])


# ---------------------------- Pure-JAX reference ----------------------------

def _ref_layernorm(x, g, b, eps=1e-5):
    m = jnp.mean(x, axis=-1, keepdims=True)
    v = jnp.mean((x - m) ** 2, axis=-1, keepdims=True)
    return (x - m) * jax.lax.rsqrt(v + eps) * g + b


def _ref_gelu_tanh(y):
    c = math.sqrt(2.0 / math.pi)
    return 0.5 * y * (1.0 + jnp.tanh(c * (y + 0.044715 * y ** 3)))


def sarika_reference(params, tokens, cfg):
    B, T = tokens.shape
    D, H = cfg["d_model"], cfg["n_head"]
    Dh = D // H
    x = params["wte"][tokens] + params["wpe"][:T][None, :, :]
    for blk in params["blocks"]:
        xn = _ref_layernorm(x, blk["ln1_g"], blk["ln1_b"])
        qkv = xn @ blk["attn_w"] + blk["attn_b"]
        qkv = qkv.reshape(B, T, 3, H, Dh)
        q = qkv[:, :, 0].transpose(0, 2, 1, 3)
        k = qkv[:, :, 1].transpose(0, 2, 1, 3)
        v = qkv[:, :, 2].transpose(0, 2, 1, 3)
        s = jnp.einsum("bhqd,bhkd->bhqk", q, k) / math.sqrt(Dh)
        mask = jnp.tril(jnp.ones((T, T), bool))
        s = jnp.where(mask, s, -jnp.inf)
        p = jax.nn.softmax(s, axis=-1)
        y = jnp.einsum("bhqk,bhkd->bhqd", p, v)
        y = y.transpose(0, 2, 1, 3).reshape(B, T, D)
        x = x + y @ blk["proj_w"] + blk["proj_b"]
        xn = _ref_layernorm(x, blk["ln2_g"], blk["ln2_b"])
        h = _ref_gelu_tanh(xn @ blk["fc_w"] + blk["fc_b"])
        x = x + h @ blk["fcproj_w"] + blk["fcproj_b"]
    xn = _ref_layernorm(x, params["lnf_g"], params["lnf_b"])
    return xn @ params["lm_head_w"]


# ---------------------------------- Main -------------------------------------

if __name__ == "__main__":
    cfg = dict(vocab_size=512, block_size=64, d_model=64,
               ff_hidden=128, n_blocks=2, n_head=4)
    B, T = 2, 16

    key = jax.random.PRNGKey(0)
    kp, kt = jax.random.split(key)
    params = init_params(kp, cfg)
    tokens = jax.random.randint(kt, (B, T), 0, cfg["vocab_size"], dtype=jnp.int32)

    logits = sarika_forward(params, tokens, cfg)
    logits = jax.block_until_ready(logits)

    ref = sarika_reference(params, tokens, cfg)
    assert logits.shape == (B, T, cfg["vocab_size"])
    assert jnp.allclose(logits, ref, rtol=1e-3, atol=1e-3), "mismatch vs reference"

    print("KERNEL_OK")
</pallas_src>

<mosaic_0001>
module attributes {stable_mosaic.version = 11 : i64} {
  func.func @_attn_block_kernel(%arg0: i32, %arg1: memref<1x16x64xf32, #tpu.memory_space<vmem>>, %arg2: memref<1x64xf32, #tpu.memory_space<vmem>>, %arg3: memref<1x64xf32, #tpu.memory_space<vmem>>, %arg4: memref<64x192xf32, #tpu.memory_space<vmem>>, %arg5: memref<1x192xf32, #tpu.memory_space<vmem>>, %arg6: memref<64x64xf32, #tpu.memory_space<vmem>>, %arg7: memref<1x64xf32, #tpu.memory_space<vmem>>, %arg8: memref<1x16x64xf32, #tpu.memory_space<vmem>>) attributes {dimension_semantics = [#tpu.dimension_semantics<parallel>], iteration_bounds = array<i64: 2>, scalar_prefetch = 0 : i64, scratch_operands = 0 : i64, tpu.core_type = #tpu.core_type<tc>, window_params = [{transform_indices = @transform_0, window_bounds = array<i64: 1, 16, 64>}, {pipeline_mode = #tpu.pipeline_mode<synchronous>, transform_indices = @transform_1, window_bounds = array<i64: 1, 64>}, {pipeline_mode = #tpu.pipeline_mode<synchronous>, transform_indices = @transform_2, window_bounds = array<i64: 1, 64>}, {pipeline_mode = #tpu.pipeline_mode<synchronous>, transform_indices = @transform_3, window_bounds = array<i64: 64, 192>}, {pipeline_mode = #tpu.pipeline_mode<synchronous>, transform_indices = @transform_4, window_bounds = array<i64: 1, 192>}, {pipeline_mode = #tpu.pipeline_mode<synchronous>, transform_indices = @transform_5, window_bounds = array<i64: 64, 64>}, {pipeline_mode = #tpu.pipeline_mode<synchronous>, transform_indices = @transform_6, window_bounds = array<i64: 1, 64>}, {transform_indices = @transform_7, window_bounds = array<i64: 1, 16, 64>}]} {
    %c0 = arith.constant 0 : index
    %c0_0 = arith.constant 0 : index
    %c0_1 = arith.constant 0 : index
    %0 = vector.load %arg1[%c0, %c0_0, %c0_1] : memref<1x16x64xf32, #tpu.memory_space<vmem>>, vector<1x16x64xf32>
    %1 = vector.shape_cast %0 : vector<1x16x64xf32> to vector<16x64xf32>
    %cst = arith.constant dense<0.000000e+00> : vector<16xf32>
    %2 = vector.multi_reduction <add>, %1, %cst [1] : vector<16x64xf32> to vector<16xf32>
    %3 = vector.shape_cast %2 : vector<16xf32> to vector<16x1xf32>
    %cst_2 = arith.constant 6.400000e+01 : f32
    %4 = vector.broadcast %cst_2 : f32 to vector<16x1xf32>
    %5 = arith.divf %3, %4 : vector<16x1xf32>
    %6 = vector.broadcast %5 : vector<16x1xf32> to vector<16x64xf32>
    %7 = arith.subf %1, %6 : vector<16x64xf32>
    %8 = arith.mulf %7, %7 : vector<16x64xf32>
    %cst_3 = arith.constant dense<0.000000e+00> : vector<16xf32>
    %9 = vector.multi_reduction <add>, %8, %cst_3 [1] : vector<16x64xf32> to vector<16xf32>
    %10 = vector.shape_cast %9 : vector<16xf32> to vector<16x1xf32>
    %cst_4 = arith.constant 6.400000e+01 : f32
    %11 = vector.broadcast %cst_4 : f32 to vector<16x1xf32>
    %12 = arith.divf %10, %11 : vector<16x1xf32>
    %cst_5 = arith.constant 9.99999974E-6 : f32
    %13 = vector.broadcast %cst_5 : f32 to vector<16x1xf32>
    %14 = arith.addf %12, %13 : vector<16x1xf32>
    %15 = math.rsqrt %14 : vector<16x1xf32>
    %16 = vector.broadcast %15 : vector<16x1xf32> to vector<16x64xf32>
    %17 = arith.mulf %7, %16 : vector<16x64xf32>
    %c0_6 = arith.constant 0 : index
    %c0_7 = arith.constant 0 : index
    %18 = vector.load %arg2[%c0_6, %c0_7] : memref<1x64xf32, #tpu.memory_space<vmem>>, vector<1x64xf32>
    %19 = vector.broadcast %18 : vector<1x64xf32> to vector<16x64xf32>
    %20 = arith.mulf %17, %19 : vector<16x64xf32>
    %c0_8 = arith.constant 0 : index
    %c0_9 = arith.constant 0 : index
    %21 = vector.load %arg3[%c0_8, %c0_9] : memref<1x64xf32, #tpu.memory_space<vmem>>, vector<1x64xf32>
    %22 = vector.broadcast %21 : vector<1x64xf32> to vector<16x64xf32>
    %23 = arith.addf %20, %22 : vector<16x64xf32>
    %c0_10 = arith.constant 0 : index
    %c0_11 = arith.constant 0 : index
    %24 = vector.load %arg4[%c0_10, %c0_11] : memref<64x192xf32, #tpu.memory_space<vmem>>, vector<64x192xf32>
    %cst_12 = arith.constant dense<0.000000e+00> : vector<16x192xf32>
    %25 = tpu.matmul %23, %24, %cst_12 {dimension_numbers = #tpu.dot_dimension_numbers<[1], [0], [0], [1], [0, 0, 1, 1], [], []>} : vector<16x64xf32>, vector<64x192xf32>, vector<16x192xf32> -> vector<16x192xf32>
    %c0_13 = arith.constant 0 : index
    %c0_14 = arith.constant 0 : index
    %26 = vector.load %arg5[%c0_13, %c0_14] : memref<1x192xf32, #tpu.memory_space<vmem>>, vector<1x192xf32>
    %27 = vector.broadcast %26 : vector<1x192xf32> to vector<16x192xf32>
    %28 = arith.addf %25, %27 : vector<16x192xf32>
    %29 = tpu.iota {dimensions = array<i32: 0>} : vector<16x16xi32>
    %30 = tpu.iota {dimensions = array<i32: 1>} : vector<16x16xi32>
    %31 = arith.cmpi sge, %29, %30 : vector<16x16xi32>
    %cst_15 = arith.constant 0.000000e+00 : f32
    %cst_16 = arith.constant -1.000000e+30 : f32
    %32 = vector.broadcast %cst_15 : f32 to vector<16x16xf32>
    %33 = vector.broadcast %cst_16 : f32 to vector<16x16xf32>
    %34 = arith.select %31, %32, %33 : vector<16x16xi1>, vector<16x16xf32>
    %c0_17 = arith.constant 0 : index
    %c0_18 = arith.constant 0 : index
    %35 = vector.load %arg6[%c0_17, %c0_18] : memref<64x64xf32, #tpu.memory_space<vmem>>, vector<64x64xf32>
    %cst_19 = arith.constant 0.000000e+00 : f32
    %36 = vector.broadcast %cst_19 : f32 to vector<16x64xf32>
    %37 = vector.extract_strided_slice %28 {offsets = [0, 0], sizes = [16, 16], strides = [1, 1]} : vector<16x192xf32> to vector<16x16xf32>
    %cst_20 = arith.constant 2.500000e-01 : f32
    %38 = vector.broadcast %cst_20 : f32 to vector<16x16xf32>
    %39 = arith.mulf %37, %38 : vector<16x16xf32>
    %40 = vector.extract_strided_slice %28 {offsets = [0, 64], sizes = [16, 16], strides = [1, 1]} : vector<16x192xf32> to vector<16x16xf32>
    %41 = vector.extract_strided_slice %28 {offsets = [0, 128], sizes = [16, 16], strides = [1, 1]} : vector<16x192xf32> to vector<16x16xf32>
    %cst_21 = arith.constant dense<0.000000e+00> : vector<16x16xf32>
    %42 = tpu.matmul %39, %40, %cst_21 {dimension_numbers = #tpu.dot_dimension_numbers<[1], [1], [0], [0], [0, 0, 1, 0], [], []>} : vector<16x16xf32>, vector<16x16xf32>, vector<16x16xf32> -> vector<16x16xf32>
    %43 = arith.addf %42, %34 : vector<16x16xf32>
    %cst_22 = arith.constant dense<0xFF800000> : vector<16xf32>
    %44 = vector.multi_reduction <maximumf>, %43, %cst_22 [1] : vector<16x16xf32> to vector<16xf32>
    %45 = vector.shape_cast %44 : vector<16xf32> to vector<16x1xf32>
    %46 = vector.broadcast %45 : vector<16x1xf32> to vector<16x16xf32>
    %47 = arith.subf %43, %46 : vector<16x16xf32>
    %48 = math.exp %47 : vector<16x16xf32>
    %cst_23 = arith.constant dense<0.000000e+00> : vector<16xf32>
    %49 = vector.multi_reduction <add>, %48, %cst_23 [1] : vector<16x16xf32> to vector<16xf32>
    %50 = vector.shape_cast %49 : vector<16xf32> to vector<16x1xf32>
    %cst_24 = arith.constant dense<0.000000e+00> : vector<16x16xf32>
    %51 = tpu.matmul %48, %41, %cst_24 {dimension_numbers = #tpu.dot_dimension_numbers<[1], [0], [0], [1], [0, 0, 1, 1], [], []>} : vector<16x16xf32>, vector<16x16xf32>, vector<16x16xf32> -> vector<16x16xf32>
    %52 = tpu.reciprocal %50 {approx = true} : vector<16x1xf32> -> vector<16x1xf32>
    %53 = vector.broadcast %52 : vector<16x1xf32> to vector<16x16xf32>
    %54 = arith.mulf %51, %53 : vector<16x16xf32>
    %55 = vector.extract_strided_slice %35 {offsets = [0, 0], sizes = [16, 64], strides = [1, 1]} : vector<64x64xf32> to vector<16x64xf32>
    %cst_25 = arith.constant dense<0.000000e+00> : vector<16x64xf32>
    %56 = tpu.matmul %54, %55, %cst_25 {dimension_numbers = #tpu.dot_dimension_numbers<[1], [0], [0], [1], [0, 0, 1, 1], [], []>} : vector<16x16xf32>, vector<16x64xf32>, vector<16x64xf32> -> vector<16x64xf32>
    %57 = arith.addf %36, %56 : vector<16x64xf32>
    %58 = vector.extract_strided_slice %28 {offsets = [0, 16], sizes = [16, 16], strides = [1, 1]} : vector<16x192xf32> to vector<16x16xf32>
    %cst_26 = arith.constant 2.500000e-01 : f32
    %59 = vector.broadcast %cst_26 : f32 to vector<16x16xf32>
    %60 = arith.mulf %58, %59 : vector<16x16xf32>
    %61 = vector.extract_strided_slice %28 {offsets = [0, 80], sizes = [16, 16], strides = [1, 1]} : vector<16x192xf32> to vector<16x16xf32>
    %62 = vector.extract_strided_slice %28 {offsets = [0, 144], sizes = [16, 16], strides = [1, 1]} : vector<16x192xf32> to vector<16x16xf32>
    %cst_27 = arith.constant dense<0.000000e+00> : vector<16x16xf32>
    %63 = tpu.matmul %60, %61, %cst_27 {dimension_numbers = #tpu.dot_dimension_numbers<[1], [1], [0], [0], [0, 0, 1, 0], [], []>} : vector<16x16xf32>, vector<16x16xf32>, vector<16x16xf32> -> vector<16x16xf32>
    %64 = arith.addf %63, %34 : vector<16x16xf32>
    %cst_28 = arith.constant dense<0xFF800000> : vector<16xf32>
    %65 = vector.multi_reduction <maximumf>, %64, %cst_28 [1] : vector<16x16xf32> to vector<16xf32>
    %66 = vector.shape_cast %65 : vector<16xf32> to vector<16x1xf32>
    %67 = vector.broadcast %66 : vector<16x1xf32> to vector<16x16xf32>
    %68 = arith.subf %64, %67 : vector<16x16xf32>
    %69 = math.exp %68 : vector<16x16xf32>
    %cst_29 = arith.constant dense<0.000000e+00> : vector<16xf32>
    %70 = vector.multi_reduction <add>, %69, %cst_29 [1] : vector<16x16xf32> to vector<16xf32>
    %71 = vector.shape_cast %70 : vector<16xf32> to vector<16x1xf32>
    %cst_30 = arith.constant dense<0.000000e+00> : vector<16x16xf32>
    %72 = tpu.matmul %69, %62, %cst_30 {dimension_numbers = #tpu.dot_dimension_numbers<[1], [0], [0], [1], [0, 0, 1, 1], [], []>} : vector<16x16xf32>, vector<16x16xf32>, vector<16x16xf32> -> vector<16x16xf32>
    %73 = tpu.reciprocal %71 {approx = true} : vector<16x1xf32> -> vector<16x1xf32>
    %74 = vector.broadcast %73 : vector<16x1xf32> to vector<16x16xf32>
    %75 = arith.mulf %72, %74 : vector<16x16xf32>
    %76 = vector.extract_strided_slice %35 {offsets = [16, 0], sizes = [16, 64], strides = [1, 1]} : vector<64x64xf32> to vector<16x64xf32>
    %cst_31 = arith.constant dense<0.000000e+00> : vector<16x64xf32>
    %77 = tpu.matmul %75, %76, %cst_31 {dimension_numbers = #tpu.dot_dimension_numbers<[1], [0], [0], [1], [0, 0, 1, 1], [], []>} : vector<16x16xf32>, vector<16x64xf32>, vector<16x64xf32> -> vector<16x64xf32>
    %78 = arith.addf %57, %77 : vector<16x64xf32>
    %79 = vector.extract_strided_slice %28 {offsets = [0, 32], sizes = [16, 16], strides = [1, 1]} : vector<16x192xf32> to vector<16x16xf32>
    %cst_32 = arith.constant 2.500000e-01 : f32
    %80 = vector.broadcast %cst_32 : f32 to vector<16x16xf32>
    %81 = arith.mulf %79, %80 : vector<16x16xf32>
    %82 = vector.extract_strided_slice %28 {offsets = [0, 96], sizes = [16, 16], strides = [1, 1]} : vector<16x192xf32> to vector<16x16xf32>
    %83 = vector.extract_strided_slice %28 {offsets = [0, 160], sizes = [16, 16], strides = [1, 1]} : vector<16x192xf32> to vector<16x16xf32>
    %cst_33 = arith.constant dense<0.000000e+00> : vector<16x16xf32>
    %84 = tpu.matmul %81, %82, %cst_33 {dimension_numbers = #tpu.dot_dimension_numbers<[1], [1], [0], [0], [0, 0, 1, 0], [], []>} : vector<16x16xf32>, vector<16x16xf32>, vector<16x16xf32> -> vector<16x16xf32>
    %85 = arith.addf %84, %34 : vector<16x16xf32>
    %cst_34 = arith.constant dense<0xFF800000> : vector<16xf32>
    %86 = vector.multi_reduction <maximumf>, %85, %cst_34 [1] : vector<16x16xf32> to vector<16xf32>
    %87 = vector.shape_cast %86 : vector<16xf32> to vector<16x1xf32>
    %88 = vector.broadcast %87 : vector<16x1xf32> to vector<16x16xf32>
    %89 = arith.subf %85, %88 : vector<16x16xf32>
    %90 = math.exp %89 : vector<16x16xf32>
    %cst_35 = arith.constant dense<0.000000e+00> : vector<16xf32>
    %91 = vector.multi_reduction <add>, %90, %cst_35 [1] : vector<16x16xf32> to vector<16xf32>
    %92 = vector.shape_cast %91 : vector<16xf32> to vector<16x1xf32>
    %cst_36 = arith.constant dense<0.000000e+00> : vector<16x16xf32>
    %93 = tpu.matmul %90, %83, %cst_36 {dimension_numbers = #tpu.dot_dimension_numbers<[1], [0], [0], [1], [0, 0, 1, 1], [], []>} : vector<16x16xf32>, vector<16x16xf32>, vector<16x16xf32> -> vector<16x16xf32>
    %94 = tpu.reciprocal %92 {approx = true} : vector<16x1xf32> -> vector<16x1xf32>
    %95 = vector.broadcast %94 : vector<16x1xf32> to vector<16x16xf32>
    %96 = arith.mulf %93, %95 : vector<16x16xf32>
    %97 = vector.extract_strided_slice %35 {offsets = [32, 0], sizes = [16, 64], strides = [1, 1]} : vector<64x64xf32> to vector<16x64xf32>
    %cst_37 = arith.constant dense<0.000000e+00> : vector<16x64xf32>
    %98 = tpu.matmul %96, %97, %cst_37 {dimension_numbers = #tpu.dot_dimension_numbers<[1], [0], [0], [1], [0, 0, 1, 1], [], []>} : vector<16x16xf32>, vector<16x64xf32>, vector<16x64xf32> -> vector<16x64xf32>
    %99 = arith.addf %78, %98 : vector<16x64xf32>
    %100 = vector.extract_strided_slice %28 {offsets = [0, 48], sizes = [16, 16], strides = [1, 1]} : vector<16x192xf32> to vector<16x16xf32>
    %cst_38 = arith.constant 2.500000e-01 : f32
    %101 = vector.broadcast %cst_38 : f32 to vector<16x16xf32>
    %102 = arith.mulf %100, %101 : vector<16x16xf32>
    %103 = vector.extract_strided_slice %28 {offsets = [0, 112], sizes = [16, 16], strides = [1, 1]} : vector<16x192xf32> to vector<16x16xf32>
    %104 = vector.extract_strided_slice %28 {offsets = [0, 176], sizes = [16, 16], strides = [1, 1]} : vector<16x192xf32> to vector<16x16xf32>
    %cst_39 = arith.constant dense<0.000000e+00> : vector<16x16xf32>
    %105 = tpu.matmul %102, %103, %cst_39 {dimension_numbers = #tpu.dot_dimension_numbers<[1], [1], [0], [0], [0, 0, 1, 0], [], []>} : vector<16x16xf32>, vector<16x16xf32>, vector<16x16xf32> -> vector<16x16xf32>
    %106 = arith.addf %105, %34 : vector<16x16xf32>
    %cst_40 = arith.constant dense<0xFF800000> : vector<16xf32>
    %107 = vector.multi_reduction <maximumf>, %106, %cst_40 [1] : vector<16x16xf32> to vector<16xf32>
    %108 = vector.shape_cast %107 : vector<16xf32> to vector<16x1xf32>
    %109 = vector.broadcast %108 : vector<16x1xf32> to vector<16x16xf32>
    %110 = arith.subf %106, %109 : vector<16x16xf32>
    %111 = math.exp %110 : vector<16x16xf32>
    %cst_41 = arith.constant dense<0.000000e+00> : vector<16xf32>
    %112 = vector.multi_reduction <add>, %111, %cst_41 [1] : vector<16x16xf32> to vector<16xf32>
    %113 = vector.shape_cast %112 : vector<16xf32> to vector<16x1xf32>
    %cst_42 = arith.constant dense<0.000000e+00> : vector<16x16xf32>
    %114 = tpu.matmul %111, %104, %cst_42 {dimension_numbers = #tpu.dot_dimension_numbers<[1], [0], [0], [1], [0, 0, 1, 1], [], []>} : vector<16x16xf32>, vector<16x16xf32>, vector<16x16xf32> -> vector<16x16xf32>
    %115 = tpu.reciprocal %113 {approx = true} : vector<16x1xf32> -> vector<16x1xf32>
    %116 = vector.broadcast %115 : vector<16x1xf32> to vector<16x16xf32>
    %117 = arith.mulf %114, %116 : vector<16x16xf32>
    %118 = vector.extract_strided_slice %35 {offsets = [48, 0], sizes = [16, 64], strides = [1, 1]} : vector<64x64xf32> to vector<16x64xf32>
    %cst_43 = arith.constant dense<0.000000e+00> : vector<16x64xf32>
    %119 = tpu.matmul %117, %118, %cst_43 {dimension_numbers = #tpu.dot_dimension_numbers<[1], [0], [0], [1], [0, 0, 1, 1], [], []>} : vector<16x16xf32>, vector<16x64xf32>, vector<16x64xf32> -> vector<16x64xf32>
    %120 = arith.addf %99, %119 : vector<16x64xf32>
    %121 = arith.addf %1, %120 : vector<16x64xf32>
    %c0_44 = arith.constant 0 : index
    %c0_45 = arith.constant 0 : index
    %122 = vector.load %arg7[%c0_44, %c0_45] : memref<1x64xf32, #tpu.memory_space<vmem>>, vector<1x64xf32>
    %123 = vector.broadcast %122 : vector<1x64xf32> to vector<16x64xf32>
    %124 = arith.addf %121, %123 : vector<16x64xf32>
    %c0_46 = arith.constant 0 : index
    %c0_47 = arith.constant 0 : index
    %c0_48 = arith.constant 0 : index
    %125 = vector.load %arg8[%c0_46, %c0_47, %c0_48] : memref<1x16x64xf32, #tpu.memory_space<vmem>>, vector<1x16x64xf32>
    %126 = vector.shape_cast %125 : vector<1x16x64xf32> to vector<16x64xf32>
    %127 = vector.shape_cast %124 : vector<16x64xf32> to vector<1x16x64xf32>
    tpu.vector_store %arg8[%c0_46, %c0_47, %c0_48], %127 {strides = array<i32>} : memref<1x16x64xf32, #tpu.memory_space<vmem>>, vector<1x16x64xf32>,
    return
  }
  func.func @transform_0(%arg0: i32) -> (i32, i32, i32) {
    %c0_i32 = arith.constant 0 : i32
    %c0_i32_0 = arith.constant 0 : i32
    %c0_i32_1 = arith.constant 0 : i32
    return %arg0, %c0_i32, %c0_i32_0 : i32, i32, i32
  }
  func.func @transform_1(%arg0: i32) -> (i32, i32) {
    %c0_i32 = arith.constant 0 : i32
    %c0_i32_0 = arith.constant 0 : i32
    %c0_i32_1 = arith.constant 0 : i32
    return %c0_i32, %c0_i32_0 : i32, i32
  }
  func.func @transform_2(%arg0: i32) -> (i32, i32) {
    %c0_i32 = arith.constant 0 : i32
    %c0_i32_0 = arith.constant 0 : i32
    %c0_i32_1 = arith.constant 0 : i32
    return %c0_i32, %c0_i32_0 : i32, i32
  }
  func.func @transform_3(%arg0: i32) -> (i32, i32) {
    %c0_i32 = arith.constant 0 : i32
    %c0_i32_0 = arith.constant 0 : i32
    %c0_i32_1 = arith.constant 0 : i32
    return %c0_i32, %c0_i32_0 : i32, i32
  }
  func.func @transform_4(%arg0: i32) -> (i32, i32) {
    %c0_i32 = arith.constant 0 : i32
    %c0_i32_0 = arith.constant 0 : i32
    %c0_i32_1 = arith.constant 0 : i32
    return %c0_i32, %c0_i32_0 : i32, i32
  }
  func.func @transform_5(%arg0: i32) -> (i32, i32) {
    %c0_i32 = arith.constant 0 : i32
    %c0_i32_0 = arith.constant 0 : i32
    %c0_i32_1 = arith.constant 0 : i32
    return %c0_i32, %c0_i32_0 : i32, i32
  }
  func.func @transform_6(%arg0: i32) -> (i32, i32) {
    %c0_i32 = arith.constant 0 : i32
    %c0_i32_0 = arith.constant 0 : i32
    %c0_i32_1 = arith.constant 0 : i32
    return %c0_i32, %c0_i32_0 : i32, i32
  }
  func.func @transform_7(%arg0: i32) -> (i32, i32, i32) {
    %c0_i32 = arith.constant 0 : i32
    %c0_i32_0 = arith.constant 0 : i32
    %c0_i32_1 = arith.constant 0 : i32
    return %arg0, %c0_i32, %c0_i32_0 : i32, i32, i32
  }
}

</mosaic_0001>

<bundles_post_ra>
// kernel: tpu_custom_call.1
= control target key start
LH: loop header
LB: loop body
LE: loop exit
PB: predicated region body
PF: predicated region fallthrough
CT: control target
= control target key end

     0   :  { %12 = vsyncpa [#allocation3], 0  ;;  %s2773_s0 = inlined_call_operand.hbm [shape: f32[2,16,64], index: 0, kind: input, shape index: {}]   ;;  %s2774_s1 = inlined_call_operand.vmem [shape: f32[1,64], index: 1, kind: input, shape index: {}]   ;;  %s2775_s2 = inlined_call_operand.vmem [shape: f32[1,64], index: 2, kind: input, shape index: {}]   ;;  %s2776_s3 = inlined_call_operand.hbm [shape: f32[64,192], index: 3, kind: input, shape index: {}]   ;;  %s2777_s4 = inlined_call_operand.vmem [shape: f32[1,192], index: 4, kind: input, shape index: {}]   ;;  %s2778_s5 = inlined_call_operand.hbm [shape: f32[64,64], index: 5, kind: input, shape index: {}]   ;;  %s2779_s6 = inlined_call_operand.vmem [shape: f32[1,64], index: 6, kind: input, shape index: {}]   ;;  %s2780_s7 = inlined_call_operand.hbm [shape: f32[2,16,64], index: 7, kind: output, shape index: {}]  }
   0x1   :  { %14 = vsyncpa [#allocation3 + $0x1], 0 }
   0x2   :  { %15 = vsyncpa [#allocation6], 0 }
   0x3   :  { %16 = vsyncpa [#allocation4], 0 }
   0x4   :  { %18 = vsyncpa [#allocation4 + $0x1], 0  ;;  %s2385_s24 = smov 0   ;;  %s2387_s25 = smov 0  }
   0x5   :  { %s2389_s26 = smov 0   ;;  %s2391_s27 = smov 0  }
   0x6 LB: > { %s2406_s28 = sadd.s32 4294967295, %s2324_s27   ;;  %s1748_s29 = sadd.s32 4294967294, %s2324_s27   ;;  %s2324_s27 = sphi %s2391_s27, %s2804_s27   ;;  %s2320_s26 = sphi %s2389_s26, %s2803_s26   ;;  %s2316_s25 = sphi %s2387_s25, %s2802_s25   ;;  %s2312_s24 = sphi %s2385_s24, %s2801_s24  }
   0x7   : > { %p44_p0 = scmp.ne.s32.totalorder %s2316_s25, %s2312_s24  ;;  %p2781_p1 = scmp.eq.s32.totalorder %s2406_s28, 0 }
   0x8   : > { %p200_p3 = scmp.eq.s32.totalorder %s1748_s29, 1  ;;  %p1749_p5 = scmp.ge.s32.totalorder %s2324_s27, 1 }
   0x9   : > { %p2415_p4 = por %p2781_p1, %p44_p0  ;;  %p207_p7 = scmp.lt.s32.totalorder %s2324_s27, 3 }
   0xa   : > { %p2420_p6 = por %p200_p3, %p44_p0  ;;  %s2326_s10 = smov [#allocation5]  }
   0xb   : > { %s2785_s30 = scalar_select %p2415_p4, 1, 0 }
   0xc   : > { %s2786_s8 = scalar_select %p2420_p6, 1, 0 }
   0xd   : > { %p2425_p8 = pnand %p1749_p5, %p207_p7  ;;  %s225_s11 = sshll.u32 %s2326_s10, 4  ;;  %s2429_s11 = int_to_ptr.vmem [resolvable:$true] %s225_s11 }
   0xe   : > { %s2327_s13 = smov [#allocation7]   ;;  %s2168_s17 = scalar_lea.hbm %s2776_s3, 2048 }
   0xf   : > { %p2027_p9 = pneg %p2425_p8  ;;  %s241_s14 = sshll.u32 %s2327_s13, 4  ;;  %s2440_s14 = int_to_ptr.vmem [resolvable:$true] %s241_s14 }
  0x10   : > { %p2169_p12 = scmp.ne.s32.totalorder %s2776_s3, %s2168_s17  ;;  %p2175_p5 = scmp.lt.u32.totalorder %s2168_s17, %s2776_s3 }
  0x11   : > { %p2436_p11 = pnand %p2027_p9, %p2781_p1 }
  0x13   : > { %p2170_p13 = pneg %p2436_p11 }
  0x15   : > { %p2171_p0 = pnand %p2170_p13, %p2169_p12 }
  0x17   : > { %p2172_p3 = pneg %p2171_p0 }
  0x19   : > { %p2177_p7 = pnand %p2175_p5, %p2172_p3 }
  0x1b   : > { %2180 = shalt.err (!%p2177_p7)
}
  0x1c   : > { %s2181_s22 = scalar_lea.vmem %s2429_s11, 2048  ;;  %p2189_p2 = scmp.lt.s32.totalorder %s2429_s11, %s2429_s11 }
  0x1d   : > { %p2182_p9 = scmp.ne.s32.totalorder %s2429_s11, %s2181_s22  ;;  %p2190_p12 = scmp.lt.s32.totalorder %s2181_s22, %s2181_s22 }
  0x1f   : > { %p2184_p10 = pnand %p2182_p9, %p2170_p13  ;;  %p2191_p0 = por %p2190_p12, %p2189_p2 }
  0x21   : > { %p2185_p1 = pneg %p2184_p10 }
  0x23   : > { %p2192_p6 = pnand %p2191_p0, %p2185_p1 }
  0x25   : > { %2195 = shalt.err (!%p2192_p6)
}
  0x26   : > { %s2328_s23 = smov 256   ;;  %s2329_s29 = smov 16  }
  0x27   : > { %2030 = dma.hbm_to_vmem [thread:$0]  (!%p2436_p11), %s2776_s3, 2048, %s2429_s11, [#allocation6], %s2328_s23, %s2328_s23, %s2329_s29  }
  0x28   : > { %s2196_s17 = scalar_lea.hbm %s2778_s5, 1024 }
  0x29   : > { %p2197_p2 = scmp.ne.s32.totalorder %s2778_s5, %s2196_s17  ;;  %p2203_p10 = scmp.lt.u32.totalorder %s2196_s17, %s2778_s5 }
  0x2b   : > { %p2199_p1 = pnand %p2197_p2, %p2170_p13 }
  0x2d   : > { %p2200_p6 = pneg %p2199_p1 }
  0x2f   : > { %p2205_p3 = pnand %p2203_p10, %p2200_p6 }
  0x31   : > { %2208 = shalt.err (!%p2205_p3)
}
  0x32   : > { %s2209_s11 = scalar_lea.vmem %s2440_s14, 1024  ;;  %p2217_p12 = scmp.lt.s32.totalorder %s2440_s14, %s2440_s14 }
  0x33   : > { %p2210_p5 = scmp.ne.s32.totalorder %s2440_s14, %s2209_s11  ;;  %p2218_p0 = scmp.lt.s32.totalorder %s2209_s11, %s2209_s11 }
  0x35   : > { %p2212_p7 = pnand %p2210_p5, %p2170_p13  ;;  %p2219_p2 = por %p2218_p0, %p2217_p12 }
  0x37   : > { %p2213_p9 = pneg %p2212_p7 }
  0x39   : > { %p2220_p1 = pnand %p2219_p2, %p2213_p9 }
  0x3b   : > { %2223 = shalt.err (!%p2220_p1)
}
  0x3c   : > { %s2782_s22 = smov 128   ;;  %s2331_s23 = smov 8  }
  0x3d   : > { %2033 = dma.hbm_to_vmem [thread:$0]  (!%p2436_p11), %s2778_s5, 1024, %s2440_s14, [#allocation6], %s2782_s22, %s2782_s22, %s2331_s23  }
  0x3e   : > { %s2498_s13 = sadd.s32 1, %s2324_s27   ;;  %s31_s16 = sadd.s32 1, %s2320_s26 }
  0x3f   : > { %s28_s15 = ssub.s32 %s2324_s27, %s2498_s13  ;;  %p38_p6 = scmp.ne.s32.totalorder %s2320_s26, %s2316_s25 }
  0x40   : > { %p29_p13 = scmp.eq.s32.totalorder %s28_s15, 0  ;;  %p39_p10 = scmp.eq.s32.totalorder %s2324_s27, 0 }
  0x41   : > { %p2789_p5 = scmp.eq.s32.totalorder %s2406_s28, 1  ;;  %p2044_p9 = scmp.lt.s32.totalorder %s2324_s27, 2 }
  0x42   : > { %s2507_s17 = scalar_select %p29_p13, %s2320_s26, %s31_s16  }
  0x43   : > { %p40_p3 = por %p39_p10, %p38_p6  ;;  %p2511_p7 = por %p2789_p5, %p38_p6 }
  0x44   : > { %s258_s18 = sand.u32 1, %s2320_s26   ;;  %s1803_s14 = sshll.u32 %s2324_s27, 8 }
  0x45   : > { %s2790_s12 = scalar_select %p2511_p7, 1, 0 }
  0x46   : > { %s1753_s19 = sshll.u32 %s258_s18, 4  ;;  %s2521_s11 = scalar_lea.hbm %s2773_s0, %s1803_s14 }
  0x47   : > { %s262_s29 = scalar_lea.vmem [#allocation2], %s1753_s19  ;;  %p2525_p11 = pnand %p2044_p9, %p40_p3 }
  0x48   : > { %s269_s10 = sshll.u32 %s262_s29, 4  ;;  %s2529_s16 = scalar_lea.sflag [#allocation3], %s258_s18  ;;  %s2523_s10 = int_to_ptr.vmem [resolvable:$true] %s269_s10 }
  0x49   : > { %s2224_s22 = scalar_lea.hbm %s2521_s11, 256  ;;  %p2226_p0 = pneg %p2525_p11 }
  0x4a   : > { %p2225_p12 = scmp.ne.s32.totalorder %s2521_s11, %s2224_s22  ;;  %s2229_s20 = scalar_lea.hbm %s2773_s0, 512 }
  0x4b   : > { %p2230_p13 = scmp.lt.u32.totalorder %s2521_s11, %s2773_s0  ;;  %p2231_p6 = scmp.lt.u32.totalorder %s2229_s20, %s2224_s22 }
  0x4c   : > { %p2227_p2 = pnand %p2226_p0, %p2225_p12  ;;  %p2233_p3 = scmp.lt.u32.totalorder %s2224_s22, %s2521_s11 }
  0x4d   : > { %p2232_p10 = por %p2231_p6, %p2230_p13 }
  0x4e   : > { %p2228_p1 = pneg %p2227_p2 }
  0x4f   : > { %p2234_p5 = por %p2233_p3, %p2232_p10 }
  0x51   : > { %p2235_p9 = pnand %p2234_p5, %p2228_p1 }
  0x53   : > { %2238 = shalt.err (!%p2235_p9)
}
  0x54   : > { %s2239_s18 = scalar_lea.vmem %s2523_s10, 256  ;;  %s2332_s19 = smov [#allocation2]  }
  0x55   : > { %p2240_p12 = scmp.ne.s32.totalorder %s2523_s10, %s2239_s18  ;;  %s2244_s14 = sshll.u32 %s2332_s19, 4  ;;  %s2245_s14 = int_to_ptr.vmem [resolvable:$false] %s2244_s14 }
  0x56   : > { %s2246_s21 = scalar_lea.vmem %s2245_s14, 512  ;;  %p2247_p4 = scmp.lt.s32.totalorder %s2523_s10, %s2245_s14 }
  0x57   : > { %p2242_p2 = pnand %p2240_p12, %p2226_p0  ;;  %p2248_p13 = scmp.lt.s32.totalorder %s2246_s21, %s2239_s18 }
  0x59   : > { %p2243_p7 = pneg %p2242_p2  ;;  %p2249_p6 = por %p2248_p13, %p2247_p4 }
  0x5b   : > { %p2250_p10 = pnand %p2249_p6, %p2243_p7 }
  0x5d   : > { %2253 = shalt.err (!%p2250_p10)
}
  0x5e   : > { %s2792_s22 = smov 128   ;;  %281 = sbr.rel (%p2425_p8) target bundleno = 2576 (0xa10), region = 48 }
  0x5f   : > { %2037 = dma.hbm_to_vmem [thread:$0]  (!%p2525_p11), %s2521_s11, 256, %s2523_s10, %s2529_s16, %s2792_s22, %s2792_s22, %s2331_s23  }
  0x60   : > { %s2563_s20 = sand.u32 (!%p2425_p8), 1, %s2316_s25   ;;  %p2793_p4 = scmp.ne.s32.totalorder (!%p2425_p8), %s2785_s30, 0 }
  0x61   : > { %s1757_s29 = sshll.u32 (!%p2425_p8), %s2563_s20, 4  ;;  %s284_s18 = scalar_lea.sflag (!%p2425_p8), [#allocation3], %s2563_s20 }
  0x62   : > { %s287_s15 = scalar_lea.vmem (!%p2425_p8), [#allocation2], %s1757_s29 }
  0x65   : > { %2299 = dma.done.wait (%p2793_p4), %s284_s18, 256  }
  0x66   : > { %2301 = vsyncadd (%p2793_p4), %s284_s18, 4294967040  ;;  %p2794_p7 = scmp.eq.s32.totalorder %s2406_s28, 0 }
  0x68   : > { %2303 = dma.done.wait (%p2794_p7), [#allocation6], 3072   ;;  %p2795_p8 = pmov %p2794_p7 }
  0x69   : > { %vm328_vm0 = vcmask 523264   ;;  %v2577_v0 = vld [vmem:[%s287_s15] sm:$0xff]  ;;  %v2579_v1 = vld [vmem:[%s287_s15 + $0x8] sm:$0xff]  ;;  %v2333_v33 = vmov 0.0   ;;  %v392_v55 = vlaneseq  ;;  %vm510_vm1 = vcmask 130048   ;;  %s2334_s19 = smov 64  }
  0x6a   : > { %2305 = vsyncadd (%p2795_p8), [#allocation6], 4294964224  ;;  %v329_v2 = vsel %vm328_vm0, %v2577_v0, 0.0  ;;  %v332_v3 = vsel %vm328_vm0, %v2579_v1, 0.0  ;;  %v375_v14 = vld [vmem:[#allocation5 + $0x8] sm:$0xff]  ;;  %v377_v15 = vld [vmem:[#allocation5 + $0x18] sm:$0xff]  ;;  %472 = vmatprep.mubr.f32.mxu0 %v2333_v33 }
  0x6b   : > { %330 = vadd.xlane.f32.xlu0 %v329_v2  ;;  %v1937_v16 = vpack.c.bf16 %v377_v15, %v375_v14  ;;  %v374_v17 = vld [vmem:[#allocation5] sm:$0xff]  ;;  %v376_v18 = vld [vmem:[#allocation5 + $0x10] sm:$0xff]  ;;  %v379_v20 = vld [vmem:[#allocation5 + $0x28] sm:$0xff]  ;;  %v393_v56 = vshrl.u32 %v392_v55, 7  ;;  %s2335_s14 = smov 112   ;;  %s2337_s21 = smov 48  }
  0x6c   : > { %v1939_v19 = vpack.c.bf16 %v376_v18, %v374_v17  ;;  %v381_v21 = vld [vmem:[#allocation5 + $0x38] sm:$0xff]  ;;  %v378_v23 = vld [vmem:[#allocation5 + $0x20] sm:$0xff]  ;;  %v380_v24 = vld [vmem:[#allocation5 + $0x30] sm:$0xff]  ;;  %s2338_s22 = smov 32   ;;  %s2339_s18 = smov 96  }
  0x6d   : > { %1938 = vmatprep.subr.bf16.mxu0 %v1937_v16  ;;  %v1941_v22 = vpack.c.bf16 %v381_v21, %v379_v20  ;;  %v1943_v25 = vpack.c.bf16 %v380_v24, %v378_v23  ;;  %v383_v26 = vld [vmem:[#allocation5 + $0x48] sm:$0xff]  ;;  %v385_v27 = vld [vmem:[#allocation5 + $0x58] sm:$0xff]  ;;  %v382_v28 = vld [vmem:[#allocation5 + $0x40] sm:$0xff]  ;;  %v394_v57 = vsub.s32 0, %v393_v56  ;;  %v398_v60 = vsub.s32 1, %v393_v56  ;;  %s2340_s15 = smov 80  }
  0x6e   : > { %1940 = vmatpush1.bf16.msra.mxu0 %v1939_v19  ;;  %v1945_v29 = vpack.c.bf16 %v385_v27, %v383_v26  ;;  %v384_v30 = vld [vmem:[#allocation5 + $0x50] sm:$0xff]  ;;  %v387_v31 = vld [vmem:[#allocation5 + $0x68] sm:$0xff]  ;;  %v389_v32 = vld [vmem:[#allocation5 + $0x78] sm:$0xff]  ;;  %v487_v18 = vadd.s32 8, %v393_v56  ;;  %v489_v19 = vand.u32 127, %v392_v55  ;;  %s2341_s30 = smov 16  }
  0x6f   : > { %333 = vadd.xlane.f32.xlu0 %v332_v3  ;;  %1942 = vmatprep.subr.bf16.mxu0 %v1941_v22  ;;  %v1947_v34 = vpack.c.bf16 %v384_v30, %v382_v28  ;;  %v1949_v35 = vpack.c.bf16 %v389_v32, %v387_v31  ;;  %v386_v36 = vld [vmem:[#allocation5 + $0x60] sm:$0xff]  ;;  %v388_v37 = vld [vmem:[#allocation5 + $0x70] sm:$0xff]  ;;  %vm2613_vm2 = vmpackc.low %vm510_vm1, %vm510_vm1  ;;  %v2336_v20 = vmov -1e+30   ;;  %s1804_s11 = sshll.u32 %s2406_s28, 8  ;;  %s325_s10 = scalar_lea.vmem [#allocation8], %s1757_s29 }
  0x70   : > { %v1951_v38 = vpack.c.bf16 %v388_v37, %v386_v36  ;;  %v1761_v46 = vld [vmem:[%s2774_s1] ss:$0 sm:$0xff]  ;;  %vm491_vm3 = vcmp.ge.s32.totalorder %v487_v18, %v489_v19  ;;  %vm490_vm4 = vcmp.ge.s32.totalorder %v393_v56, %v489_v19  ;;  %v496_v19 = vld [vmem:[#allocation7 + $0x10] sm:$0xff]  ;;  %s1656_s16 = sshll.u32 %s325_s10, 4  ;;  %s1643_s28 = scalar_lea.sflag [#allocation4], %s2563_s20  ;;  %s2727_s16 = int_to_ptr.vmem [resolvable:$true] %s1656_s16 }
  0x71   : > { %v1762_v48 = vld [vmem:[%s2775_s2] ss:$0 sm:$0xff]  ;;  %v2622_v21 = vsel %vm491_vm3, 0.0, %v2336_v20  ;;  %v2624_v23 = vsel %vm490_vm4, 0.0, %v2336_v20  ;;  %v497_v20 = vld [vmem:[#allocation7 + $0x18] sm:$0xff]  ;;  %s2254_s29 = scalar_lea.vmem %s2727_s16, 256 }
  0x72   : > { %1944 = vmatpush1.bf16.msra.mxu0 %v1943_v25  ;;  %v390_v58 = vld [vmem:[%s2777_s4] sm:$0x3]  ;;  %p2255_p11 = scmp.ne.s32.totalorder %s2727_s16, %s2254_s29  ;;  %p2798_p0 = scmp.ne.s32.totalorder %s2790_s12, 0 }
  0x73   : > { %1946 = vmatprep.subr.bf16.mxu0 %v1945_v29  ;;  %v395_v59 = vrot.slane %v390_v58, %v394_v57  ;;  %v399_v2 = vrot.slane %v390_v58, %v398_v60 }
  0x74   : > { %p2256_p1 = pnand %p2255_p11, %p2798_p0 }
  0x76   : > { %1948 = vmatpush1.bf16.msra.mxu0 %v1947_v34  ;;  %p2257_p3 = pneg %p2256_p1 }
  0x77   : > { %1950 = vmatprep.subr.bf16.mxu0 %v1949_v35 }
  0x7a   : > { %1952 = vmatpush1.bf16.msra.mxu0 %v1951_v38 }
  0xf8   : > { %v331_v4 = vpop.xlane.xlu0 %330 }
  0xf9   : > { %v336_v5 = vmul.f32 0.015625, %v331_v4 }
  0xfb   : > { %v338_v6 = vsub.f32 %v2577_v0, %v336_v5 }
  0xfc   : > { %v334_v7 = vpop.xlane.xlu0 %333 }
  0xfd   : > { %v337_v8 = vmul.f32 0.015625, %v334_v7  ;;  %v340_v9 = vmul.f32 %v338_v6, %v338_v6 }
  0xff   : > { %v339_v10 = vsub.f32 %v2579_v1, %v337_v8  ;;  %v342_v11 = vsel %vm328_vm0, %v340_v9, 0.0 }
 0x100   : > { %343 = vadd.xlane.f32.xlu1 %v342_v11 }
 0x101   : > { %v341_v12 = vmul.f32 %v339_v10, %v339_v10 }
 0x103   : > { %v345_v13 = vsel %vm328_vm0, %v341_v12, 0.0 }
 0x104   : > { %346 = vadd.xlane.f32.xlu1 %v345_v13 }
 0x18d   : > { %v344_v39 = vpop.xlane.xlu1 %343 }
 0x18e   : > { %v348_v40 = vmul.f32 0.015625, %v344_v39 }
 0x190   : > { %v350_v41 = vadd.f32 1e-05, %v348_v40 }
 0x191   : > { %v347_v42 = vpop.xlane.xlu1 %346 }
 0x192   : > { %2132 = vrsqrt.f32 %v350_v41  ;;  %v349_v43 = vmul.f32 0.015625, %v347_v42 }
 0x194   : > { %v351_v44 = vadd.f32 1e-05, %v349_v43 }
 0x196   : > { %2134 = vrsqrt.f32 %v351_v44 }
 0x19c   : > { %v2133_v45 = vpop.eup %2132 }
 0x19d   : > { %v354_v47 = vmul.f32 %v2133_v45, %v338_v6 }
 0x19f   : > { %v363_v49 = vmul.f32 %v1761_v46, %v354_v47 }
 0x1a0   : > { %v2135_v50 = vpop.eup %2134 }
 0x1a1   : > { %v372_v51 = vadd.f32 %v1762_v48, %v363_v49  ;;  %v355_v52 = vmul.f32 %v2135_v50, %v339_v10 }
 0x1a3   : > { %1763 = vmatmul.mubr.msk.f32.vlgmr.msra.gmra.mrb[0].mxu0 %vm328_vm0, %v372_v51  ;;  %v364_v53 = vmul.f32 %v1761_v46, %v355_v52 }
 0x1a4   : > { %478 = vmatprep.mubr.f32.mxu0 %v2333_v33 }
 0x1a5   : > { %v373_v54 = vadd.f32 %v1762_v48, %v364_v53 }
 0x1a7   : > { %1764 = vmatmul.mubr.msk.f32.gmra.mrb[2].mxu0 %vm328_vm0, %v373_v54 }
 0x276   : > { %v474_v61 = vpop.f32.mrb[0].mxu0 }
 0x277   : > { %v475_v62 = vadd.f32 %v474_v61, %v395_v59  ;;  %v476_v63 = vpop.f32.mrb[1].mxu0 }
 0x278   : > { %v477_v7 = vadd.f32 %v476_v63, %v399_v2 }
 0x279   : > { %v2600_v3 = vmul.f32 0.25, %v475_v62 }
 0x27a   : > { %v480_v4 = vpop.f32.mrb[2].mxu0 }
 0x27b   : > { %v481_v5 = vadd.f32 %v480_v4, %v395_v59  ;;  %v482_v6 = vpop.f32.mrb[3].mxu0  ;;  %1857 = vmatprep.mubr.msk.f32.mxu1 %vm510_vm1, %v2600_v3 }
 0x27c   : > { %v483_v8 = vadd.f32 %v482_v6, %v399_v2 }
 0x27d   : > { %v2604_v9 = vpack.i.bf16 %v481_v5, %v475_v62  ;;  %v503_v17 = vmul.f32 0.25, %v481_v5 }
 0x27e   : > { %v1959_v10 = vpack.c.bf16 %v483_v8, %v477_v7  ;;  %v2606_v11 = vpack.i.bf16 %v483_v8, %v477_v7 }
 0x27f   : > { %2098 = vrot.lane.b32.xlu0 %v2604_v9, %s2334_s19 }
 0x283   : > { %699 = vrot.lane.b32.xlu0 %v2600_v3, %s2335_s14 }
 0x2f1   : > { %v2099_v12 = vpop.permute.xlu0 %2098 }
 0x2f2   : > { %v2101_v13 = vunpack.i.h.bf16 %v2099_v12  ;;  %v2100_v14 = vunpack.i.l.bf16 %v2099_v12 }
 0x2f4   : > { %v1953_v16 = vpack.c.bf16 %v2101_v13, %v2100_v14 }
 0x2f5   : > { %v700_v41 = vpop.permute.xlu0 %699 }
 0x2f6   : > { %1955 = vmatprep.subr.msk.bf16.mxu1 %vm2613_vm2, %v1953_v16 }
 0x2f7   : > { %1958 = vmatpush3.bf16.xpose.msk.msra.mxu1 %vm2613_vm2, %v1953_v16 }
 0x2f8   : > { %1960 = vmatprep.subr.bf16.mxu1 %v1959_v10 }
 0x2fe   : > { %1858 = vmatmul.mubr.msk.f32.vlgmr.msra.gmra.mrb[0].mxu1 %vm510_vm1, %v503_v17 }
 0x2ff   : > { %1962 = vmatpush3.bf16.msra.mxu1 %v1959_v10 }
 0x3d1   : > { %v1859_v22 = vpop.f32.mrb[0].mxu1 }
 0x3d2   : > { %v593_v24 = vadd.f32 %v1859_v22, %v2622_v21  ;;  %v587_v25 = vpop.f32.mrb[1].mxu1  ;;  %v1973_v22 = vpack.c.bf16 %v497_v20, %v496_v19 }
 0x3d3   : > { %v588_v26 = vadd.f32 %v587_v25, %v2624_v23  ;;  %v495_v25 = vld [vmem:[#allocation7 + $0x8] sm:$0xff] }
 0x3d4   : > { %v599_v27 = vsel %vm510_vm1, %v593_v24, -inf }
 0x3d5   : > { %600 = vmax.xlane.f32.xlu1 %v599_v27  ;;  %v596_v28 = vsel %vm510_vm1, %v588_v26, -inf }
 0x3d9   : > { %597 = vmax.xlane.f32.xlu1 %v596_v28 }
 0x3ea   : > { %2103 = vrot.lane.b32.xlu1 %v2604_v9, %s2337_s21  ;;  %s2725_s21 = scalar_lea.hbm %s2780_s7, %s1804_s11 }
 0x3ee   : > { %701 = vrot.lane.b32.xlu1 %v503_v17, %s2335_s14 }
 0x462   : > { %v601_v29 = vpop.xlane.xlu1 %600 }
 0x463   : > { %v603_v30 = vsub.f32 %v593_v24, %v601_v29  ;;  %v494_v24 = vld [vmem:[#allocation7] sm:$0xff] }
 0x465   : > { %v606_v33 = vmul.f32 1.442695, %v603_v30 }
 0x466   : > { %v598_v31 = vpop.xlane.xlu1 %597 }
 0x467   : > { %v602_v32 = vsub.f32 %v588_v26, %v598_v31  ;;  %v1977_v26 = vpack.c.bf16 %v495_v25, %v494_v24 }
 0x469   : > { %v604_v34 = vmul.f32 1.442695, %v602_v32 }
 0x46a   : > { %v2104_v35 = vpop.permute.xlu1 %2103 }
 0x46b   : > { %2136 = vpow2.f32 %v604_v34  ;;  %v2106_v36 = vunpack.i.h.bf16 %v2104_v35  ;;  %v2105_v37 = vunpack.i.l.bf16 %v2104_v35 }
 0x46c   : > { %2138 = vpow2.f32 %v606_v33 }
 0x46d   : > { %v1963_v38 = vpack.c.bf16 %v2106_v36, %v2105_v37 }
 0x46e   : > { %v702_v42 = vpop.permute.xlu1 %701 }
 0x46f   : > { %1965 = vmatprep.subr.msk.bf16.mxu1 %vm2613_vm2, %v1963_v38 }
 0x475   : > { %v2634_v39 = vpop.eup %2136 }
 0x476   : > { %v2636_v40 = vpop.eup %2138  ;;  %1864 = vmatprep.mubr.msk.f32.mxu1 %vm510_vm1, %v2634_v39  ;;  %v608_v13 = vsel %vm510_vm1, %v2634_v39, 0.0 }
 0x477   : > { %1865 = vmatmul.mubr.msk.f32.vlgmr.msra.gmra.mrb[2].mxu1 %vm510_vm1, %v2636_v40  ;;  %v611_v16 = vsel %vm510_vm1, %v2636_v40, 0.0 }
 0x478   : > { %1968 = vmatpush3.bf16.xpose.msk.msra.mxu1 %vm2613_vm2, %v1963_v38  ;;  %1871 = vmatprep.mubr.msk.f32.mxu1 %vm510_vm1, %v700_v41 }
 0x479   : > { %1974 = vmatprep.subr.bf16.mxu1 %v1973_v22 }
 0x47f   : > { %1872 = vmatmul.mubr.msk.f32.vlgmr.msra.gmra.mrb[4].mxu1 %vm510_vm1, %v702_v42 }
 0x480   : > { %1976 = vmatpush3.bf16.msra.mxu1 %v1973_v22 }
 0x481   : > { %1978 = vmatprep.subr.bf16.mxu1 %v1977_v26 }
 0x54a   : > { %v2646_v43 = vpop.f32.mrb[2].mxu1 }
 0x54b   : > { %v2648_v44 = vpop.f32.mrb[3].mxu1 }
 0x552   : > { %v1873_v45 = vpop.f32.mrb[4].mxu1 }
 0x553   : > { %v787_v46 = vadd.f32 %v1873_v45, %v2622_v21  ;;  %v781_v47 = vpop.f32.mrb[5].mxu1 }
 0x554   : > { %v782_v48 = vadd.f32 %v781_v47, %v2624_v23 }
 0x555   : > { %v793_v49 = vsel %vm510_vm1, %v787_v46, -inf }
 0x556   : > { %794 = vmax.xlane.f32.xlu1 %v793_v49  ;;  %v790_v50 = vsel %vm510_vm1, %v782_v48, -inf }
 0x557   : > { %791 = vmax.xlane.f32.xlu0 %v790_v50 }
 0x567   : > { %2113 = vrot.lane.b32.xlu1 %v2604_v9, %s2338_s22  ;;  %s2342_s22 = smov [#allocation8]  }
 0x56b   : > { %1065 = vrot.lane.b32.xlu1 %v503_v17, %s2339_s18 }
 0x56d   : > { %2108 = vrot.lane.b32.xlu0 %v2606_v11, %s2335_s14 }
 0x56f   : > { %1346 = vrot.lane.b32.xlu1 %v2600_v3, %s2340_s15 }
 0x571   : > { %1063 = vrot.lane.b32.xlu0 %v2600_v3, %s2339_s18 }
 0x575   : > { %2118 = vrot.lane.b32.xlu0 %v2604_v9, %s2341_s30 }
 0x579   : > { %1348 = vrot.lane.b32.xlu0 %v503_v17, %s2340_s15 }
 0x5e3   : > { %v795_v51 = vpop.xlane.xlu1 %794 }
 0x5e4   : > { %v797_v52 = vsub.f32 %v787_v46, %v795_v51  ;;  %v792_v53 = vpop.xlane.xlu0 %791 }
 0x5e5   : > { %v796_v54 = vsub.f32 %v782_v48, %v792_v53 }
 0x5e6   : > { %v800_v55 = vmul.f32 1.442695, %v797_v52 }
 0x5e7   : > { %v798_v56 = vmul.f32 1.442695, %v796_v54  ;;  %v2114_v57 = vpop.permute.xlu1 %2113 }
 0x5e8   : > { %2140 = vpow2.f32 %v800_v55  ;;  %v2116_v58 = vunpack.i.h.bf16 %v2114_v57  ;;  %v2109_v59 = vpop.permute.xlu0 %2108  ;;  %v2115_v60 = vunpack.i.l.bf16 %v2114_v57  ;;  %v498_v57 = vld [vmem:[#allocation7 + $0x20] sm:$0xff] }
 0x5e9   : > { %2142 = vpow2.f32 %v798_v56  ;;  %v2111_v61 = vunpack.i.h.bf16 %v2109_v59  ;;  %v2110_v62 = vunpack.i.l.bf16 %v2109_v59 }
 0x5ea   : > { %v1981_v3 = vpack.c.bf16 %v2116_v58, %v2115_v60  ;;  %v499_v58 = vld [vmem:[#allocation7 + $0x28] sm:$0xff] }
 0x5eb   : > { %v1969_v63 = vpack.c.bf16 %v2111_v61, %v2110_v62  ;;  %v1066_v14 = vpop.permute.xlu1 %1065  ;;  %v1991_v61 = vpack.c.bf16 %v499_v58, %v498_v57 }
 0x5ec   : > { %v1064_v2 = vpop.permute.xlu0 %1063 }
 0x5ed   : > { %1970 = vmatprep.subr.bf16.mxu0 %v1969_v63 }
 0x5ee   : > { %1972 = vmatpush3.bf16.msra.mxu0 %v1969_v63 }
 0x5ef   : > { %1983 = vmatprep.subr.msk.bf16.mxu0 %vm2613_vm2, %v1981_v3  ;;  %v1347_v17 = vpop.permute.xlu1 %1346 }
 0x5f0   : > { %v2119_v4 = vpop.permute.xlu0 %2118 }
 0x5f1   : > { %v2121_v6 = vunpack.i.h.bf16 %v2119_v4  ;;  %v2120_v7 = vunpack.i.l.bf16 %v2119_v4 }
 0x5f2   : > { %v2141_v5 = vpop.eup %2140 }
 0x5f3   : > { %v2143_v8 = vpop.eup %2142  ;;  %v805_v9 = vsel %vm510_vm1, %v2141_v5, 0.0  ;;  %v1995_v12 = vpack.c.bf16 %v2121_v6, %v2120_v7 }
 0x5f4   : > { %806 = vadd.xlane.f32.xlu0 %v805_v9  ;;  %1878 = vmatprep.mubr.msk.f32.mxu0 %vm510_vm1, %v2143_v8  ;;  %v802_v10 = vsel %vm510_vm1, %v2143_v8, 0.0  ;;  %v1349_v18 = vpop.permute.xlu0 %1348 }
 0x5f5   : > { %803 = vadd.xlane.f32.xlu1 %v802_v10  ;;  %1879 = vmatmul.mubr.msk.f32.vlgmr.msra.gmra.mrb[4].mxu0 %vm510_vm1, %v2141_v5 }
 0x5f6   : > { %1899 = vmatprep.mubr.msk.f32.mxu0 %vm510_vm1, %v1064_v2 }
 0x5f7   : > { %1986 = vmatpush3.bf16.xpose.msk.msra.mxu0 %vm2613_vm2, %v1981_v3 }
 0x5f8   : > { %609 = vadd.xlane.f32.xlu0 %v608_v13  ;;  %1997 = vmatprep.subr.msk.bf16.mxu0 %vm2613_vm2, %v1995_v12 }
 0x5fc   : > { %612 = vadd.xlane.f32.xlu0 %v611_v16 }
 0x5fe   : > { %1900 = vmatmul.mubr.msk.f32.vlgmr.msra.gmra.mrb[6].mxu0 %vm510_vm1, %v1066_v14 }
 0x5ff   : > { %2000 = vmatpush3.bf16.xpose.msk.msra.mxu0 %vm2613_vm2, %v1995_v12  ;;  %1920 = vmatprep.mubr.msk.f32.mxu0 %vm510_vm1, %v1347_v17 }
 0x606   : > { %1921 = vmatmul.mubr.msk.f32.vlgmr.msra.gmra.mrb[8].mxu0 %vm510_vm1, %v1349_v18 }
 0x681   : > { %v807_v27 = vpop.xlane.xlu0 %806 }
 0x682   : > { %v804_v28 = vpop.xlane.xlu1 %803 }
 0x683   : > { %2144 = vrcp.f32 %v804_v28 }
 0x685   : > { %v610_v29 = vpop.xlane.xlu0 %609 }
 0x686   : > { %2146 = vrcp.f32 %v610_v29 }
 0x687   : > { %2148 = vrcp.f32 %v807_v27 }
 0x689   : > { %v613_v15 = vpop.xlane.xlu0 %612 }
 0x68a   : > { %2150 = vrcp.f32 %v613_v15  ;;  %v500_v15 = vld [vmem:[#allocation7 + $0x30] sm:$0xff] }
 0x68d   : > { %v2145_v30 = vpop.eup %2144 }
 0x690   : > { %v2147_v32 = vpop.eup %2146 }
 0x691   : > { %v2149_v34 = vpop.eup %2148  ;;  %v697_v37 = vmul.f32 %v2147_v32, %v2648_v44 }
 0x694   : > { %v2151_v38 = vpop.eup %2150 }
 0x695   : > { %v698_v42 = vmul.f32 %v2151_v38, %v2646_v43 }
 0x6c8   : > { %v1880_v31 = vpop.f32.mrb[4].mxu0 }
 0x6c9   : > { %v888_v33 = vpop.f32.mrb[5].mxu0  ;;  %v900_v36 = vmul.f32 %v2149_v34, %v1880_v31 }
 0x6ca   : > { %v899_v35 = vmul.f32 %v2145_v30, %v888_v33  ;;  %v501_v30 = vld [vmem:[#allocation7 + $0x38] sm:$0xff] }
 0x6cb   : > { %v2005_v31 = vpack.c.bf16 %v501_v30, %v500_v15 }
 0x6cc   : > { %1885 = vmatprep.mubr.msk.f32.mxu1 %vm510_vm1, %v899_v35 }
 0x6cd   : > { %1886 = vmatmul.mubr.msk.f32.vlgmr.msra.gmra.mrb[6].mxu1 %vm510_vm1, %v900_v36 }
 0x6ce   : > { %1892 = vmatprep.mubr.msk.f32.mxu1 %vm510_vm1, %v697_v37  ;;  %1980 = vmatpush3.bf16.msra.mxu1 %v1977_v26 }
 0x6d1   : > { %v1901_v39 = vpop.f32.mrb[6].mxu0 }
 0x6d2   : > { %v1151_v40 = vadd.f32 %v1901_v39, %v2622_v21  ;;  %v1145_v41 = vpop.f32.mrb[7].mxu0 }
 0x6d3   : > { %v1146_v45 = vadd.f32 %v1145_v41, %v2624_v23  ;;  %v1797_v41 = vld [vmem:[%s2779_s6] ss:$0 sm:$0xff] }
 0x6d4   : > { %v1157_v46 = vsel %vm510_vm1, %v1151_v40, -inf }
 0x6d5   : > { %1158 = vmax.xlane.f32.xlu0 %v1157_v46  ;;  %1893 = vmatmul.mubr.msk.f32.vlgmr.msra.gmra.mrb[6].mxu1 %vm510_vm1, %v698_v42  ;;  %v1154_v44 = vsel %vm510_vm1, %v1146_v45, -inf }
 0x6d6   : > { %1155 = vmax.xlane.f32.xlu1 %v1154_v44 }
 0x6d9   : > { %v1922_v47 = vpop.f32.mrb[8].mxu0 }
 0x6da   : > { %v1428_v48 = vpop.f32.mrb[9].mxu0  ;;  %v1434_v9 = vadd.f32 %v1922_v47, %v2622_v21 }
 0x6db   : > { %v1429_v49 = vadd.f32 %v1428_v48, %v2624_v23 }
 0x6dc   : > { %v1440_v12 = vsel %vm510_vm1, %v1434_v9, -inf }
 0x6dd   : > { %v1437_v50 = vsel %vm510_vm1, %v1429_v49, -inf }
 0x6de   : > { %1438 = vmax.xlane.f32.xlu0 %v1437_v50 }
 0x6e7   : > { %2123 = vrot.lane.b32.xlu1 %v2606_v11, %s2339_s18  ;;  %s2258_s18 = sshll.u32 %s2342_s22, 4  ;;  %s2259_s18 = int_to_ptr.vmem [resolvable:$false] %s2258_s18 }
 0x6e8   : > { %p2261_p5 = scmp.lt.s32.totalorder %s2727_s16, %s2259_s18 }
 0x6eb   : > { %2128 = vrot.lane.b32.xlu1 %v2606_v11, %s2340_s15  ;;  %s2260_s15 = scalar_lea.vmem %s2259_s18, 512 }
 0x6ec   : > { %p2262_p9 = scmp.lt.s32.totalorder %s2260_s15, %s2254_s29 }
 0x6ee   : > { %p2263_p12 = por %p2262_p9, %p2261_p5 }
 0x6f0   : > { %p2264_p2 = pnand %p2263_p12, %p2257_p3 }
 0x762   : > { %v1159_v43 = vpop.xlane.xlu0 %1158 }
 0x763   : > { %v1161_v51 = vsub.f32 %v1151_v40, %v1159_v43  ;;  %v1156_v52 = vpop.xlane.xlu1 %1155 }
 0x764   : > { %v1160_v53 = vsub.f32 %v1146_v45, %v1156_v52 }
 0x765   : > { %v1164_v54 = vmul.f32 1.442695, %v1161_v51 }
 0x766   : > { %v1162_v55 = vmul.f32 1.442695, %v1160_v53 }
 0x767   : > { %2152 = vpow2.f32 %v1164_v54  ;;  %v2124_v56 = vpop.permute.xlu1 %2123 }
 0x768   : > { %2154 = vpow2.f32 %v1162_v55  ;;  %v2126_v23 = vunpack.i.h.bf16 %v2124_v56  ;;  %v2125_v59 = vunpack.i.l.bf16 %v2124_v56 }
 0x76a   : > { %v1987_v60 = vpack.c.bf16 %v2126_v23, %v2125_v59 }
 0x76b   : > { %v1439_v62 = vpop.xlane.xlu0 %1438  ;;  %v2129_v2 = vpop.permute.xlu1 %2128 }
 0x76c   : > { %v1443_v63 = vsub.f32 %v1429_v49, %v1439_v62  ;;  %1988 = vmatprep.subr.bf16.mxu1 %v1987_v60  ;;  %v2131_v3 = vunpack.i.h.bf16 %v2129_v2  ;;  %v2130_v4 = vunpack.i.l.bf16 %v2129_v2 }
 0x76d   : > { %1990 = vmatpush3.bf16.msra.mxu1 %v1987_v60 }
 0x76e   : > { %v1445_v11 = vmul.f32 1.442695, %v1443_v63  ;;  %1992 = vmatprep.subr.bf16.mxu1 %v1991_v61  ;;  %v2001_v8 = vpack.c.bf16 %v2131_v3, %v2130_v4 }
 0x770   : > { %2156 = vpow2.f32 %v1445_v11 }
 0x771   : > { %v2153_v5 = vpop.eup %2152 }
 0x772   : > { %v2155_v6 = vpop.eup %2154  ;;  %v1169_v7 = vsel %vm510_vm1, %v2153_v5, 0.0 }
 0x773   : > { %1170 = vadd.xlane.f32.xlu0 %v1169_v7  ;;  %1906 = vmatprep.mubr.msk.f32.mxu1 %vm510_vm1, %v2155_v6  ;;  %v1166_v10 = vsel %vm510_vm1, %v2155_v6, 0.0 }
 0x774   : > { %1907 = vmatmul.mubr.msk.f32.vlgmr.msra.gmra.mrb[8].mxu1 %vm510_vm1, %v2153_v5 }
 0x775   : > { %1994 = vmatpush3.bf16.msra.mxu1 %v1991_v61 }
 0x776   : > { %2002 = vmatprep.subr.bf16.mxu1 %v2001_v8 }
 0x777   : > { %1167 = vadd.xlane.f32.xlu0 %v1166_v10 }
 0x77a   : > { %v2157_v13 = vpop.eup %2156 }
 0x77b   : > { %1441 = vmax.xlane.f32.xlu0 %v1440_v12  ;;  %v1449_v14 = vsel %vm510_vm1, %v2157_v13, 0.0 }
 0x77f   : > { %1450 = vadd.xlane.f32.xlu0 %v1449_v14 }
 0x800   : > { %v1171_v16 = vpop.xlane.xlu0 %1170 }
 0x804   : > { %v1168_v17 = vpop.xlane.xlu0 %1167 }
 0x808   : > { %v1442_v18 = vpop.xlane.xlu0 %1441 }
 0x809   : > { %v1444_v19 = vsub.f32 %v1434_v9, %v1442_v18 }
 0x80b   : > { %v1447_v20 = vmul.f32 1.442695, %v1444_v19 }
 0x80c   : > { %v1451_v32 = vpop.xlane.xlu0 %1450 }
 0x80d   : > { %2158 = vpow2.f32 %v1447_v20 }
 0x80e   : > { %2160 = vrcp.f32 %v1168_v17 }
 0x80f   : > { %2162 = vrcp.f32 %v1171_v16 }
 0x810   : > { %2164 = vrcp.f32 %v1451_v32 }
 0x817   : > { %v2159_v22 = vpop.eup %2158 }
 0x818   : > { %v1452_v21 = vsel %vm510_vm1, %v2159_v22, 0.0  ;;  %v2161_v25 = vpop.eup %2160 }
 0x819   : > { %1453 = vadd.xlane.f32.xlu1 %v1452_v21  ;;  %v2163_v27 = vpop.eup %2162 }
 0x81a   : > { %v2165_v35 = vpop.eup %2164 }
 0x847   : > { %v1908_v24 = vpop.f32.mrb[8].mxu1 }
 0x848   : > { %v1250_v26 = vpop.f32.mrb[9].mxu1  ;;  %v1262_v29 = vmul.f32 %v2163_v27, %v1908_v24 }
 0x849   : > { %v1261_v28 = vmul.f32 %v2161_v25, %v1250_v26 }
 0x84b   : > { %1913 = vmatprep.mubr.msk.f32.mxu1 %vm510_vm1, %v1261_v28 }
 0x84c   : > { %1914 = vmatmul.mubr.msk.f32.vlgmr.msra.gmra.mrb[6].mxu1 %vm510_vm1, %v1262_v29 }
 0x84d   : > { %2004 = vmatpush3.bf16.msra.mxu1 %v2001_v8  ;;  %1927 = vmatprep.mubr.msk.f32.mxu1 %vm510_vm1, %v2157_v13 }
 0x84e   : > { %2006 = vmatprep.subr.bf16.mxu1 %v2005_v31 }
 0x850   : > { %1928 = vmatmul.mubr.msk.f32.vlgmr.msra.gmra.mrb[10].mxu1 %vm510_vm1, %v2159_v22 }
 0x851   : > { %2008 = vmatpush3.bf16.msra.mxu1 %v2005_v31 }
 0x8a6   : > { %v1454_v33 = vpop.xlane.xlu1 %1453 }
 0x8a7   : > { %2166 = vrcp.f32 %v1454_v33 }
 0x8b1   : > { %v2167_v37 = vpop.eup %2166 }
 0x923   : > { %v1929_v34 = vpop.f32.mrb[10].mxu1 }
 0x924   : > { %v1533_v36 = vpop.f32.mrb[11].mxu1  ;;  %v1545_v39 = vmul.f32 %v2167_v37, %v1929_v34 }
 0x925   : > { %v1544_v38 = vmul.f32 %v2165_v35, %v1533_v36 }
 0x927   : > { %1934 = vmatprep.mubr.msk.f32.mxu1 %vm510_vm1, %v1544_v38 }
 0x928   : > { %1935 = vmatmul.mubr.msk.f32.vlgmr.msra.gmra.mrb[6].mxu1 %vm510_vm1, %v1545_v39 }
 0x9fb   : > { %v1936_v40 = vpop.f32.mrb[6].mxu1 }
 0x9fc   : > { %v1630_v42 = vadd.f32 %v1936_v40, %v2579_v1  ;;  %v1618_v45 = vpop.f32.mrb[7].mxu1 }
 0x9fd   : > { %v1629_v46 = vadd.f32 %v1618_v45, %v2577_v0 }
 0x9fe   : > { %v1639_v44 = vadd.f32 %v1797_v41, %v1630_v42 }
 0x9ff   : > { %v1638_v47 = vadd.f32 %v1797_v41, %v1629_v46 }
 0xa00   : > { %1641 = vst.msk [vmem:[%s325_s10 + $0x8] sm:$0xff] %vm328_vm0, %v1639_v44 }
 0xa01   : > { %1640 = vst.msk [vmem:[%s325_s10] sm:$0xff] %vm328_vm0, %v1638_v47 }
 0xa02   : > { %2267 = shalt.err (!%p2264_p2)
}
 0xa03   : > { %s2268_s30 = scalar_lea.hbm %s2725_s21, 256  ;;  %s2272_s11 = scalar_lea.hbm %s2780_s7, 512 }
 0xa04   : > { %p2269_p13 = scmp.ne.s32.totalorder %s2725_s21, %s2268_s30  ;;  %p2273_p4 = scmp.lt.u32.totalorder %s2725_s21, %s2780_s7 }
 0xa05   : > { %p2274_p7 = scmp.lt.u32.totalorder %s2272_s11, %s2268_s30  ;;  %p2276_p11 = scmp.lt.u32.totalorder %s2268_s30, %s2725_s21 }
 0xa06   : > { %p2270_p6 = pnand %p2269_p13, %p2798_p0 }
 0xa07   : > { %p2275_p8 = por %p2274_p7, %p2273_p4 }
 0xa08   : > { %p2271_p10 = pneg %p2270_p6 }
 0xa09   : > { %p2277_p1 = por %p2276_p11, %p2275_p8 }
 0xa0b   : > { %p2278_p3 = pnand %p2277_p1, %p2271_p10 }
 0xa0d   : > { %2281 = shalt.err (!%p2278_p3)
}
 0xa0e   : > { %s2343_s14 = smov 128   ;;  %s2344_s29 = smov 8  }
 0xa0f   : > { %2025 = dma.vmem_to_hbm [thread:$0]  (%p2798_p0), %s2727_s16, 256, %s2725_s21, %s1643_s28, %s2343_s14, %s2343_s14, %s2344_s29  }
 0xa10 PF: > { %s1671_s22 = sand.u32 1, %s2312_s24   ;;  %p2799_p5 = scmp.ne.s32.totalorder %s2786_s8, 0 }
 0xa11   : > { %p2800_p9 = scmp.ge.s32.totalorder %s2324_s27, 2  ;;  %s1672_s18 = scalar_lea.sflag [#allocation4], %s1671_s22 }
 0xa13   : > { %p2039_p12 = pnand %p2800_p9, %p2799_p5 }
 0xa15   : > { %2307 = dma.done.wait (!%p2039_p12), %s1672_s18, 256  }
 0xa16   : > { %2309 = vsyncadd (!%p2039_p12), %s1672_s18, 4294967040  ;;  %p21_p2 = scmp.ge.s32.totalorder %s2498_s13, 4   ;;  %s2801_s24 = smov %s2316_s25 }
 0xa17   : > { %s2802_s25 = smov %s2320_s26  ;;  %s2803_s26 = smov %s2507_s17 }
 0xa18   : > { %s2804_s27 = smov %s2498_s13  ;;  %23 = sbr.rel (!%p21_p2) target bundleno = 6 (0x6), region = 101 }
 0xa1f   :  { %1677 = vsyncpa [#allocation3], 1 }
 0xa20   :  { %1679 = vsyncpa [#allocation3 + $0x1], 1 }
 0xa21   :  { %1680 = vsyncpa [#allocation6], 1 }
 0xa22   :  { %1681 = vsyncpa [#allocation4], 1 }
 0xa23   :  { %1683 = vsyncpa [#allocation4 + $0x1], 1 }

</bundles_post_ra>
